<compile_context>
chip_gen: v6e
topology: v6e:2x2x1
jax: 0.10.0
libtpu: 0.0.40
codegen_flags: <defaults>
</compile_context>

<pallas_src>
import jax
import jax.numpy as jnp
from jax.experimental import pallas as pl
from jax.experimental.pallas import tpu as pltpu

_VMEM = pltpu.MemorySpace.VMEM


# ----------------------------- tiled conv / matmul kernel -----------------------------

def _make_conv_kernel(act, has_res):
    """Tap-reduced matmul with fused bias (+ residual add) + activation epilogue."""
    def kernel(*refs):
        if has_res:
            x_ref, w_ref, b_ref, r_ref, o_ref, acc_ref = refs
        else:
            x_ref, w_ref, b_ref, o_ref, acc_ref = refs

        @pl.when(pl.program_id(2) == 0)
        def _init():
            acc_ref[...] = jnp.zeros_like(acc_ref)

        acc_ref[...] += jnp.dot(x_ref[...], w_ref[...],
                                preferred_element_type=jnp.float32)

        @pl.when(pl.program_id(2) == pl.num_programs(2) - 1)
        def _finalize():
            y = acc_ref[...] + b_ref[...]
            if has_res:
                y = y + r_ref[...]
            if act == "relu":
                y = jnp.maximum(y, 0.0)
            elif act == "sigmoid":
                y = jax.nn.sigmoid(y)
            o_ref[...] = y.astype(o_ref.dtype)

    return kernel


_CONV_KERNELS = {(a, r): _make_conv_kernel(a, r)
                 for a in ("none", "relu", "sigmoid") for r in (False, True)}


def _pick_tile(dim, target, align):
    """Largest tile <= target that divides dim and is `align`-aligned (or the full dim)."""
    if dim <= target:
        return dim
    t = (target // align) * align
    while t >= align:
        if dim % t == 0:
            return t
        t -= align
    return dim


def conv_matmul(x_taps, w, bias, residual=None, act="none",
                compute_dtype=jnp.bfloat16):
    """out = act( sum_t x_taps[t] @ w[t] + bias [+ residual] ).

    x_taps: (T, M, K); w: (T, K, N); bias: (N,); residual: (M, N) or None.
    """
    T, M, K = x_taps.shape
    _, _, N = w.shape
    tm = _pick_tile(M, 512, 8)     # sublane-aligned M tile
    tn = _pick_tile(N, 256, 128)   # lane-aligned N tile

    args = [x_taps.astype(compute_dtype), w.astype(compute_dtype),
            bias.reshape(1, N).astype(jnp.float32)]
    in_specs = [
        pl.BlockSpec((None, tm, K), lambda m, n, t: (t, m, 0)),
        pl.BlockSpec((None, K, tn), lambda m, n, t: (t, 0, n)),
        pl.BlockSpec((1, tn), lambda m, n, t: (0, n)),
    ]
    has_res = residual is not None
    if has_res:
        args.append(residual.astype(jnp.float32))
        in_specs.append(pl.BlockSpec((tm, tn), lambda m, n, t: (m, n)))

    return pl.pallas_call(
        _CONV_KERNELS[(act, has_res)],
        out_shape=jax.ShapeDtypeStruct((M, N), jnp.float32),
        grid=(M // tm, N // tn, T),
        in_specs=in_specs,
        out_specs=pl.BlockSpec((tm, tn), lambda m, n, t: (m, n)),
        scratch_shapes=[pltpu.VMEM((tm, tn), jnp.float32)],
        compiler_params=pltpu.CompilerParams(
            dimension_semantics=("parallel", "parallel", "arbitrary")),
    )(*args)


# ----------------------------- pooling kernels -----------------------------

def _maxpool9_kernel(x_ref, o_ref):
    y = x_ref[0]
    for i in range(1, 9):
        y = jnp.maximum(y, x_ref[i])
    o_ref[...] = y


def maxpool_3x3_s2_p1(x):
    B, H, W, C = x.shape
    Ho = (H + 2 - 3) // 2 + 1
    Wo = (W + 2 - 3) // 2 + 1
    xp = jnp.pad(x, ((0, 0), (1, 1), (1, 1), (0, 0)), constant_values=-jnp.inf)
    taps = [xp[:, i:i + 2 * (Ho - 1) + 1:2, j:j + 2 * (Wo - 1) + 1:2, :]
            .reshape(B * Ho * Wo, C)
            for i in range(3) for j in range(3)]
    stacked = jnp.stack(taps, axis=0)
    out = pl.pallas_call(
        _maxpool9_kernel,
        out_shape=jax.ShapeDtypeStruct((B * Ho * Wo, C), jnp.float32),
        in_specs=[pl.BlockSpec(memory_space=_VMEM)],
        out_specs=pl.BlockSpec(memory_space=_VMEM),
    )(stacked.astype(jnp.float32))
    return out.reshape(B, Ho, Wo, C)


def _global_avg_kernel(x_ref, o_ref):
    o_ref[...] = jnp.mean(x_ref[...], axis=1, keepdims=True)


def global_avgpool(x):
    B, H, W, C = x.shape
    out = pl.pallas_call(
        _global_avg_kernel,
        out_shape=jax.ShapeDtypeStruct((B, 1, C), jnp.float32),
        in_specs=[pl.BlockSpec(memory_space=_VMEM)],
        out_specs=pl.BlockSpec(memory_space=_VMEM),
    )(x.reshape(B, H * W, C).astype(jnp.float32))
    return out.reshape(B, C)


# ----------------------------- conv glue -----------------------------

def _extract_taps(x, k, stride, pad):
    """Return ((T, B*Ho*Wo, C) tap slabs, (B, Ho, Wo)).  T == 1 for 1x1/s1 (free reshape)."""
    B, H, W, C = x.shape
    if pad:
        x = jnp.pad(x, ((0, 0), (pad, pad), (pad, pad), (0, 0)))
    Hp, Wp = H + 2 * pad, W + 2 * pad
    Ho = (Hp - k) // stride + 1
    Wo = (Wp - k) // stride + 1
    if k == 1 and stride == 1:
        return x.reshape(1, B * Ho * Wo, C), (B, Ho, Wo)
    taps = []
    for i in range(k):
        for j in range(k):
            taps.append(x[:, i:i + stride * (Ho - 1) + 1:stride,
                          j:j + stride * (Wo - 1) + 1:stride, :]
                        .reshape(B * Ho * Wo, C))
    return jnp.stack(taps, axis=0), (B, Ho, Wo)


def conv(x, p, stride=1, pad=0, act="none", residual=None):
    """NHWC conv using the packed (T, K, N) bf16 weight + folded f32 bias."""
    T, K, N = p["w"].shape
    k = 1 if T == 1 else int(round(T ** 0.5))
    taps, (B, Ho, Wo) = _extract_taps(x.astype(jnp.bfloat16), k, stride, pad)
    res = residual.reshape(B * Ho * Wo, N) if residual is not None else None
    out = conv_matmul(taps, p["w"], p["b"], residual=res, act=act)
    return out.reshape(B, Ho, Wo, N)


# ----------------------------- bilinear 2x upsample (align_corners=True) -----------------------------

def _interp_matrix(n_in, n_out):
    src = jnp.arange(n_out, dtype=jnp.float32) * (n_in - 1) / (n_out - 1)
    lo = jnp.clip(jnp.floor(src).astype(jnp.int32), 0, n_in - 2)
    frac = src - lo.astype(jnp.float32)
    eye = jnp.eye(n_in, dtype=jnp.float32)
    return (1.0 - frac)[:, None] * eye[lo] + frac[:, None] * eye[lo + 1]  # (n_out, n_in)


def upsample_bilinear_2x(x):
    B, H, W, C = x.shape
    Ho, Wo = 2 * H, 2 * W
    if H == 1:                       # bilinear from a single row == copy
        x = jnp.repeat(x, 2, axis=1)
    else:
        A = _interp_matrix(H, Ho).T                      # (H, Ho)
        xt = jnp.moveaxis(x, 1, 3).reshape(B * W * C, H)
        y = conv_matmul(xt.reshape(1, B * W * C, H), A.reshape(1, H, Ho),
                        jnp.zeros((Ho,), jnp.float32), act="none",
                        compute_dtype=jnp.float32)
        x = jnp.moveaxis(y.reshape(B, W, C, Ho), 3, 1)
    if W == 1:
        x = jnp.repeat(x, 2, axis=2)
    else:
        A = _interp_matrix(W, Wo).T                      # (W, Wo)
        xt = jnp.moveaxis(x, 2, 3).reshape(B * Ho * C, W)
        y = conv_matmul(xt.reshape(1, B * Ho * C, W), A.reshape(1, W, Wo),
                        jnp.zeros((Wo,), jnp.float32), act="none",
                        compute_dtype=jnp.float32)
        x = jnp.moveaxis(y.reshape(B, Ho, C, Wo), 3, 2)
    return x


# ----------------------------- parameter construction -----------------------------

class ParamInit:
    def __init__(self, seed=0):
        self._key = jax.random.PRNGKey(seed)
        self._n = 0

    def _next(self):
        self._n += 1
        return jax.random.fold_in(self._key, self._n)

    def conv(self, cout, cin, kh, kw):
        fan_in = cin * kh * kw
        std = (2.0 / fan_in) ** 0.5
        return jax.random.normal(self._next(), (cout, cin, kh, kw), jnp.float32) * std

    def bias(self, cout, fan_in):
        bound = 1.0 / (fan_in ** 0.5)
        return jax.random.uniform(self._next(), (cout,), jnp.float32, -bound, bound)

    def bn(self, c):
        # PyTorch BatchNorm2d defaults: gamma=1, beta=0, running_mean=0, running_var=1
        return {"gamma": jnp.ones((c,), jnp.float32), "beta": jnp.zeros((c,), jnp.float32),
                "mean": jnp.zeros((c,), jnp.float32), "var": jnp.ones((c,), jnp.float32)}

    def linear(self, cout, cin):
        bound = (1.0 / cin) ** 0.5
        w = jax.random.uniform(self._next(), (cout, cin), jnp.float32, -bound, bound)
        b = jax.random.uniform(self._next(), (cout,), jnp.float32, -bound, bound)
        return w, b


def _pack(w_torch, bias_f32):
    """torch (Cout, Cin, kh, kw) -> precomputed (kh*kw, Cin, Cout) bf16 + f32 bias."""
    cout, cin, kh, kw = w_torch.shape
    w = jnp.transpose(w_torch, (2, 3, 1, 0)).reshape(kh * kw, cin, cout)
    return {"w": w.astype(jnp.bfloat16), "b": bias_f32.astype(jnp.float32)}


def _pack_conv_bn(w_torch, bn, eps=1e-5):
    scale = bn["gamma"] / jnp.sqrt(bn["var"] + eps)
    return _pack(w_torch * scale[:, None, None, None], bn["beta"] - bn["mean"] * scale)


def make_params(seed=0, input_ch=4):
    init = ParamInit(seed)

    def conv_bn_p(cout, cin, k):
        return _pack_conv_bn(init.conv(cout, cin, k, k), init.bn(cout))

    def conv_bias_p(cout, cin, k):
        return _pack(init.conv(cout, cin, k, k), init.bias(cout, cin * k * k))

    # deep-stem ResNet-50 (CSAIL resnet variant used by the original code)
    bk = {"conv1": conv_bn_p(64, input_ch, 3),
          "conv2": conv_bn_p(64, 64, 3),
          "conv3": conv_bn_p(128, 64, 3)}
    layers = []
    inplanes = 128
    for planes, nblocks, stride in ((64, 3, 1), (128, 4, 2), (256, 6, 2), (512, 3, 2)):
        blocks = []
        for b in range(nblocks):
            s = stride if b == 0 else 1
            bp = {"stride": s,
                  "conv1": conv_bn_p(planes, inplanes, 1),
                  "conv2": conv_bn_p(planes, planes, 3),
                  "conv3": conv_bn_p(planes * 4, planes, 1)}
            if s != 1 or inplanes != planes * 4:
                bp["down"] = conv_bn_p(planes * 4, inplanes, 1)
            inplanes = planes * 4
            blocks.append(bp)
        layers.append(blocks)
    bk["layers"] = layers
    fw, fb = init.linear(2, 2048)
    bk["fc"] = {"w": fw.T.reshape(1, 2048, 2).astype(jnp.bfloat16),
                "b": fb.astype(jnp.float32)}

    dec = {}
    for name, cin in (("c5", 2048), ("c4", 1024), ("c3", 512), ("c2", 256), ("c1", 128)):
        dec[name] = conv_bias_p(64, cin, 1)
    for name in ("up5", "up4", "up3", "up2", "up1", "up0"):   # up1/up0 unused (as in PyTorch forward)
        dec[name] = conv_bias_p(64, 64, 1)
    dec["p0"] = conv_bias_p(64, 64, 3)
    dec["lp"] = conv_bias_p(1, 64, 1)
    return {"backbone": bk, "decoder": dec}


# ----------------------------- model forward -----------------------------

def bottleneck(x, p):
    s = p["stride"]
    out = conv(x, p["conv1"], stride=1, pad=0, act="relu")
    out = conv(out, p["conv2"], stride=s, pad=1, act="relu")
    if "down" in p:
        identity = conv(x, p["down"], stride=s, pad=0, act="none")
    else:
        identity = x
    # conv3 + BN + residual add + ReLU fused into one kernel epilogue
    return conv(out, p["conv3"], stride=1, pad=0, act="relu", residual=identity)


def backbone_forward(P, x):
    x = conv(x, P["conv1"], stride=2, pad=1, act="relu")
    x = conv(x, P["conv2"], stride=1, pad=1, act="relu")
    x1 = conv(x, P["conv3"], stride=1, pad=1, act="relu")
    x = maxpool_3x3_s2_p1(x1)
    feats = []
    for blocks in P["layers"]:
        for bp in blocks:
            x = bottleneck(x, bp)
        feats.append(x)
    x2, x3, x4, x5 = feats
    pooled = global_avgpool(x5)                                   # [B, 2048]
    contact = conv_matmul(pooled.reshape(1, pooled.shape[0], 2048).astype(jnp.bfloat16),
                          P["fc"]["w"], P["fc"]["b"], act="none")  # nn.Linear(2048, 2)
    return x1, x2, x3, x4, x5, contact


def top_down(D, feats):
    c1, c2, c3, c4, c5 = feats
    p5 = conv(c5, D["c5"], act="relu")
    # up_conv(upsample(p)) + relu(lateral(c)) : lateral relu conv first, then
    # the up 1x1 conv with the lateral as a fused residual (act="none").
    lat4 = conv(c4, D["c4"], act="relu")
    p4 = conv(upsample_bilinear_2x(p5), D["up5"], act="none", residual=lat4)
    lat3 = conv(c3, D["c3"], act="relu")
    p3 = conv(upsample_bilinear_2x(p4), D["up4"], act="none", residual=lat3)
    lat2 = conv(c2, D["c2"], act="relu")
    p2 = conv(upsample_bilinear_2x(p3), D["up3"], act="none", residual=lat2)
    lat1 = conv(c1, D["c1"], act="relu")
    p1 = conv(upsample_bilinear_2x(p2), D["up2"], act="none", residual=lat1)
    p0 = upsample_bilinear_2x(p1)
    p0 = conv(p0, D["p0"], stride=1, pad=1, act="relu")
    return p0


def baseline_forward(params, x_nchw):
    x = jnp.transpose(x_nchw, (0, 2, 3, 1)).astype(jnp.float32)   # NCHW -> NHWC
    c1, c2, c3, c4, c5, contact = backbone_forward(params["backbone"], x)
    p0 = top_down(params["decoder"], (c1, c2, c3, c4, c5))
    prob = conv(p0, params["decoder"]["lp"], act="sigmoid")
    prob = jnp.transpose(prob, (0, 3, 1, 2))                      # back to NCHW
    return contact, prob


if __name__ == "__main__":
    # cfg: arch=resnet50 (deep stem), input_channel=4, pretrained=False (synthetic init)
    params = make_params(seed=0, input_ch=4)
    key = jax.random.PRNGKey(0)
    x = jax.random.normal(key, (2, 4, 32, 32), jnp.float32)       # NCHW like PyTorch
    contact, prob = baseline_forward(params, x)
    jax.block_until_ready((contact, prob))
    assert contact.shape == (2, 2)
    assert prob.shape == (2, 1, 32, 32)
    assert bool(jnp.all(jnp.isfinite(contact))) and bool(jnp.all((prob >= 0) & (prob <= 1)))
    print("KERNEL_OK")
</pallas_src>

<mosaic_0001>
module attributes {stable_mosaic.version = 11 : i64} {
  func.func @kernel(%arg0: i32, %arg1: i32, %arg2: i32, %arg3: memref<1x512x4xbf16, #tpu.memory_space<vmem>>, %arg4: memref<1x4x64xbf16, #tpu.memory_space<vmem>>, %arg5: memref<1x64xf32, #tpu.memory_space<vmem>>, %arg6: memref<512x64xf32, #tpu.memory_space<vmem>>, %arg7: memref<512x64xf32, #tpu.memory_space<vmem>>) attributes {dimension_semantics = [#tpu.dimension_semantics<parallel>, #tpu.dimension_semantics<parallel>, #tpu.dimension_semantics<arbitrary>], iteration_bounds = array<i64: 1, 1, 9>, scalar_prefetch = 0 : i64, scratch_operands = 1 : i64, tpu.core_type = #tpu.core_type<tc>, window_params = [{transform_indices = @transform_0, window_bounds = array<i64: 1, 512, 4>}, {transform_indices = @transform_1, window_bounds = array<i64: 1, 4, 64>}, {transform_indices = @transform_2, window_bounds = array<i64: 1, 64>}, {transform_indices = @transform_3, window_bounds = array<i64: 512, 64>}]} {
    %c0_i32 = arith.constant 0 : i32
    %0 = arith.cmpi eq, %arg2, %c0_i32 : i32
    %1 = arith.extui %0 : i1 to i32
    %c0_i32_0 = arith.constant 0 : i32
    %2 = arith.cmpi ne, %1, %c0_i32_0 : i32
    scf.if %2 {
      %cst_11 = arith.constant 0.000000e+00 : f32
      %14 = vector.broadcast %cst_11 : f32 to vector<512x64xf32>
      %c0_12 = arith.constant 0 : index
      %c0_13 = arith.constant 0 : index
      %15 = vector.load %arg7[%c0_12, %c0_13] : memref<512x64xf32, #tpu.memory_space<vmem>>, vector<512x64xf32>
      tpu.vector_store %arg7[%c0_12, %c0_13], %14 {strides = array<i32>} : memref<512x64xf32, #tpu.memory_space<vmem>>, vector<512x64xf32>,
    } else {
    }
    %c0 = arith.constant 0 : index
    %c0_1 = arith.constant 0 : index
    %3 = vector.load %arg7[%c0, %c0_1] : memref<512x64xf32, #tpu.memory_space<vmem>>, vector<512x64xf32>
    %c0_2 = arith.constant 0 : index
    %c0_3 = arith.constant 0 : index
    %c0_4 = arith.constant 0 : index
    %4 = vector.load %arg3[%c0_2, %c0_3, %c0_4] : memref<1x512x4xbf16, #tpu.memory_space<vmem>>, vector<1x512x4xbf16>
    %5 = vector.shape_cast %4 : vector<1x512x4xbf16> to vector<512x4xbf16>
    %c0_5 = arith.constant 0 : index
    %c0_6 = arith.constant 0 : index
    %c0_7 = arith.constant 0 : index
    %6 = vector.load %arg4[%c0_5, %c0_6, %c0_7] : memref<1x4x64xbf16, #tpu.memory_space<vmem>>, vector<1x4x64xbf16>
    %7 = vector.shape_cast %6 : vector<1x4x64xbf16> to vector<4x64xbf16>
    %cst = arith.constant dense<0.000000e+00> : vector<512x64xf32>
    %8 = tpu.matmul %5, %7, %cst {dimension_numbers = #tpu.dot_dimension_numbers<[1], [0], [0], [1], [0, 0, 1, 1], [], []>} : vector<512x4xbf16>, vector<4x64xbf16>, vector<512x64xf32> -> vector<512x64xf32>
    %9 = arith.addf %3, %8 : vector<512x64xf32>
    %c0_8 = arith.constant 0 : index
    %c0_9 = arith.constant 0 : index
    %10 = vector.load %arg7[%c0_8, %c0_9] : memref<512x64xf32, #tpu.memory_space<vmem>>, vector<512x64xf32>
    tpu.vector_store %arg7[%c0_8, %c0_9], %9 {strides = array<i32>} : memref<512x64xf32, #tpu.memory_space<vmem>>, vector<512x64xf32>,
    %c8_i32 = arith.constant 8 : i32
    %11 = arith.cmpi eq, %arg2, %c8_i32 : i32
    %12 = arith.extui %11 : i1 to i32
    %c0_i32_10 = arith.constant 0 : i32
    %13 = arith.cmpi ne, %12, %c0_i32_10 : i32
    scf.if %13 {
      %c0_11 = arith.constant 0 : index
      %c0_12 = arith.constant 0 : index
      %14 = vector.load %arg7[%c0_11, %c0_12] : memref<512x64xf32, #tpu.memory_space<vmem>>, vector<512x64xf32>
      %c0_13 = arith.constant 0 : index
      %c0_14 = arith.constant 0 : index
      %15 = vector.load %arg5[%c0_13, %c0_14] : memref<1x64xf32, #tpu.memory_space<vmem>>, vector<1x64xf32>
      %16 = vector.broadcast %15 : vector<1x64xf32> to vector<512x64xf32>
      %17 = arith.addf %14, %16 : vector<512x64xf32>
      %cst_15 = arith.constant 0.000000e+00 : f32
      %18 = vector.broadcast %cst_15 : f32 to vector<512x64xf32>
      %19 = arith.maximumf %17, %18 : vector<512x64xf32>
      %c0_16 = arith.constant 0 : index
      %c0_17 = arith.constant 0 : index
      %20 = vector.load %arg6[%c0_16, %c0_17] : memref<512x64xf32, #tpu.memory_space<vmem>>, vector<512x64xf32>
      tpu.vector_store %arg6[%c0_16, %c0_17], %19 {strides = array<i32>} : memref<512x64xf32, #tpu.memory_space<vmem>>, vector<512x64xf32>,
    } else {
    }
    return
  }
  func.func @transform_0(%arg0: i32, %arg1: i32, %arg2: i32) -> (i32, i32, i32) {
    %c0_i32 = arith.constant 0 : i32
    %c0_i32_0 = arith.constant 0 : i32
    return %arg2, %arg0, %c0_i32 : i32, i32, i32
  }
  func.func @transform_1(%arg0: i32, %arg1: i32, %arg2: i32) -> (i32, i32, i32) {
    %c0_i32 = arith.constant 0 : i32
    %c0_i32_0 = arith.constant 0 : i32
    return %arg2, %c0_i32, %arg1 : i32, i32, i32
  }
  func.func @transform_2(%arg0: i32, %arg1: i32, %arg2: i32) -> (i32, i32) {
    %c0_i32 = arith.constant 0 : i32
    %c0_i32_0 = arith.constant 0 : i32
    return %c0_i32, %arg1 : i32, i32
  }
  func.func @transform_3(%arg0: i32, %arg1: i32, %arg2: i32) -> (i32, i32) {
    %c0_i32 = arith.constant 0 : i32
    return %arg0, %arg1 : i32, i32
  }
}

</mosaic_0001>

<bundles_post_ra>
// kernel: tpu_custom_call.1
= control target key start
LH: loop header
LB: loop body
LE: loop exit
PB: predicated region body
PF: predicated region fallthrough
CT: control target
= control target key end

     0   :  { %s1795_s12 = smov 0   ;;  %s1797_s13 = smov 0   ;;  %s2420_s0 = inlined_call_operand.vmem [shape: bf16[9,512,4], index: 0, kind: input, shape index: {}]   ;;  %s2421_s1 = inlined_call_operand.vmem [shape: bf16[9,4,64], index: 1, kind: input, shape index: {}]   ;;  %s2422_s2 = inlined_call_operand.vmem [shape: f32[1,64], index: 2, kind: input, shape index: {}]   ;;  %s2423_s3 = inlined_call_operand.vmem [shape: f32[512,64], index: 3, kind: output, shape index: {}]  }
   0x1   :  { %s1799_s14 = smov 0  }
   0x2 LB: > { %s25_s15 = sadd.s32 1, %s1768_s13  ;;  %p1514_p0 = scmp.ge.s32.totalorder %s1772_s14, 1  ;;  %s1772_s14 = sphi %s1799_s14, %s13_s14   ;;  %s1768_s13 = sphi %s1797_s13, %s2425_s13   ;;  %s1764_s12 = sphi %s1795_s12, %s2424_s12  }
   0x3   : > { %p26_p1 = scmp.ge.s32.totalorder %s25_s15, 9  ;;  %p187_p2 = scmp.lt.s32.totalorder %s1772_s14, 10 }
   0x5   : > { %s2427_s15 = smov (%p26_p1, %s25_s15), 0  ;;  %p188_p3 = pnand %p1514_p0, %p187_p2 }
   0x6   : > { %p229_p4 = scmp.lt.s32.totalorder (!%p188_p3), %s1764_s12, 8  ;;  %p1518_p5 = scmp.ne.s32.totalorder (!%p188_p3), %s1764_s12, 0 }
   0x7   : > { %191 = sbr.rel (%p188_p3) target bundleno = 352 (0x160), region = 32 }
   0xc   : > { %s230_s16 = scalar_select %p229_p4, %s1764_s12, 8 }
   0xd   : > { %261 = sbr.rel (%p1518_p5) target bundleno = 51 (0x33), region = 36 }
   0xe   : > { %s1589_s17 = sshll.u32 %s230_s16, 8  ;;  %s1517_s18 = sshll.u32 %s230_s16, 1 }
   0xf   : > { %s1820_s21 = scalar_lea.vmem %s2420_s0, %s1589_s17  ;;  %s1825_s24 = scalar_lea.vmem %s2421_s1, %s1517_s18 }
  0x12   : > { %vm262_vm0 = vcmask 523264   ;;  %v1774_v0 = vmov 0.0  }
  0x13   : > { %263 = vst.msk [vmem:[#allocation2] sm:$0xff] %vm262_vm0, %v1774_v0  ;;  %264 = vst.msk [vmem:[#allocation2 + $0x8] sm:$0xff] %vm262_vm0, %v1774_v0 }
  0x14   : > { %265 = vst.msk [vmem:[#allocation2 + $0x10] sm:$0xff] %vm262_vm0, %v1774_v0  ;;  %266 = vst.msk [vmem:[#allocation2 + $0x18] sm:$0xff] %vm262_vm0, %v1774_v0 }
  0x15   : > { %267 = vst.msk [vmem:[#allocation2 + $0x20] sm:$0xff] %vm262_vm0, %v1774_v0  ;;  %268 = vst.msk [vmem:[#allocation2 + $0x28] sm:$0xff] %vm262_vm0, %v1774_v0 }
  0x16   : > { %269 = vst.msk [vmem:[#allocation2 + $0x30] sm:$0xff] %vm262_vm0, %v1774_v0  ;;  %270 = vst.msk [vmem:[#allocation2 + $0x38] sm:$0xff] %vm262_vm0, %v1774_v0 }
  0x17   : > { %271 = vst.msk [vmem:[#allocation2 + $0x40] sm:$0xff] %vm262_vm0, %v1774_v0  ;;  %272 = vst.msk [vmem:[#allocation2 + $0x48] sm:$0xff] %vm262_vm0, %v1774_v0 }
  0x18   : > { %273 = vst.msk [vmem:[#allocation2 + $0x50] sm:$0xff] %vm262_vm0, %v1774_v0  ;;  %274 = vst.msk [vmem:[#allocation2 + $0x58] sm:$0xff] %vm262_vm0, %v1774_v0 }
  0x19   : > { %275 = vst.msk [vmem:[#allocation2 + $0x60] sm:$0xff] %vm262_vm0, %v1774_v0  ;;  %276 = vst.msk [vmem:[#allocation2 + $0x68] sm:$0xff] %vm262_vm0, %v1774_v0 }
  0x1a   : > { %277 = vst.msk [vmem:[#allocation2 + $0x70] sm:$0xff] %vm262_vm0, %v1774_v0  ;;  %278 = vst.msk [vmem:[#allocation2 + $0x78] sm:$0xff] %vm262_vm0, %v1774_v0 }
  0x1b   : > { %279 = vst.msk [vmem:[#allocation2 + $0x80] sm:$0xff] %vm262_vm0, %v1774_v0  ;;  %280 = vst.msk [vmem:[#allocation2 + $0x88] sm:$0xff] %vm262_vm0, %v1774_v0 }
  0x1c   : > { %281 = vst.msk [vmem:[#allocation2 + $0x90] sm:$0xff] %vm262_vm0, %v1774_v0  ;;  %282 = vst.msk [vmem:[#allocation2 + $0x98] sm:$0xff] %vm262_vm0, %v1774_v0 }
  0x1d   : > { %283 = vst.msk [vmem:[#allocation2 + $0xa0] sm:$0xff] %vm262_vm0, %v1774_v0  ;;  %284 = vst.msk [vmem:[#allocation2 + $0xa8] sm:$0xff] %vm262_vm0, %v1774_v0 }
  0x1e   : > { %285 = vst.msk [vmem:[#allocation2 + $0xb0] sm:$0xff] %vm262_vm0, %v1774_v0  ;;  %286 = vst.msk [vmem:[#allocation2 + $0xb8] sm:$0xff] %vm262_vm0, %v1774_v0 }
  0x1f   : > { %287 = vst.msk [vmem:[#allocation2 + $0xc0] sm:$0xff] %vm262_vm0, %v1774_v0  ;;  %288 = vst.msk [vmem:[#allocation2 + $0xc8] sm:$0xff] %vm262_vm0, %v1774_v0 }
  0x20   : > { %289 = vst.msk [vmem:[#allocation2 + $0xd0] sm:$0xff] %vm262_vm0, %v1774_v0  ;;  %290 = vst.msk [vmem:[#allocation2 + $0xd8] sm:$0xff] %vm262_vm0, %v1774_v0 }
  0x21   : > { %291 = vst.msk [vmem:[#allocation2 + $0xe0] sm:$0xff] %vm262_vm0, %v1774_v0  ;;  %292 = vst.msk [vmem:[#allocation2 + $0xe8] sm:$0xff] %vm262_vm0, %v1774_v0 }
  0x22   : > { %293 = vst.msk [vmem:[#allocation2 + $0xf0] sm:$0xff] %vm262_vm0, %v1774_v0  ;;  %294 = vst.msk [vmem:[#allocation2 + $0xf8] sm:$0xff] %vm262_vm0, %v1774_v0 }
  0x23   : > { %295 = vst.msk [vmem:[#allocation2 + $0x100] sm:$0xff] %vm262_vm0, %v1774_v0  ;;  %296 = vst.msk [vmem:[#allocation2 + $0x108] sm:$0xff] %vm262_vm0, %v1774_v0 }
  0x24   : > { %297 = vst.msk [vmem:[#allocation2 + $0x110] sm:$0xff] %vm262_vm0, %v1774_v0  ;;  %298 = vst.msk [vmem:[#allocation2 + $0x118] sm:$0xff] %vm262_vm0, %v1774_v0 }
  0x25   : > { %299 = vst.msk [vmem:[#allocation2 + $0x120] sm:$0xff] %vm262_vm0, %v1774_v0  ;;  %300 = vst.msk [vmem:[#allocation2 + $0x128] sm:$0xff] %vm262_vm0, %v1774_v0 }
  0x26   : > { %301 = vst.msk [vmem:[#allocation2 + $0x130] sm:$0xff] %vm262_vm0, %v1774_v0  ;;  %302 = vst.msk [vmem:[#allocation2 + $0x138] sm:$0xff] %vm262_vm0, %v1774_v0 }
  0x27   : > { %303 = vst.msk [vmem:[#allocation2 + $0x140] sm:$0xff] %vm262_vm0, %v1774_v0  ;;  %304 = vst.msk [vmem:[#allocation2 + $0x148] sm:$0xff] %vm262_vm0, %v1774_v0 }
  0x28   : > { %305 = vst.msk [vmem:[#allocation2 + $0x150] sm:$0xff] %vm262_vm0, %v1774_v0  ;;  %306 = vst.msk [vmem:[#allocation2 + $0x158] sm:$0xff] %vm262_vm0, %v1774_v0 }
  0x29   : > { %307 = vst.msk [vmem:[#allocation2 + $0x160] sm:$0xff] %vm262_vm0, %v1774_v0  ;;  %308 = vst.msk [vmem:[#allocation2 + $0x168] sm:$0xff] %vm262_vm0, %v1774_v0 }
  0x2a   : > { %309 = vst.msk [vmem:[#allocation2 + $0x170] sm:$0xff] %vm262_vm0, %v1774_v0  ;;  %310 = vst.msk [vmem:[#allocation2 + $0x178] sm:$0xff] %vm262_vm0, %v1774_v0 }
  0x2b   : > { %311 = vst.msk [vmem:[#allocation2 + $0x180] sm:$0xff] %vm262_vm0, %v1774_v0  ;;  %312 = vst.msk [vmem:[#allocation2 + $0x188] sm:$0xff] %vm262_vm0, %v1774_v0 }
  0x2c   : > { %313 = vst.msk [vmem:[#allocation2 + $0x190] sm:$0xff] %vm262_vm0, %v1774_v0  ;;  %314 = vst.msk [vmem:[#allocation2 + $0x198] sm:$0xff] %vm262_vm0, %v1774_v0 }
  0x2d   : > { %315 = vst.msk [vmem:[#allocation2 + $0x1a0] sm:$0xff] %vm262_vm0, %v1774_v0  ;;  %316 = vst.msk [vmem:[#allocation2 + $0x1a8] sm:$0xff] %vm262_vm0, %v1774_v0 }
  0x2e   : > { %317 = vst.msk [vmem:[#allocation2 + $0x1b0] sm:$0xff] %vm262_vm0, %v1774_v0  ;;  %318 = vst.msk [vmem:[#allocation2 + $0x1b8] sm:$0xff] %vm262_vm0, %v1774_v0 }
  0x2f   : > { %319 = vst.msk [vmem:[#allocation2 + $0x1c0] sm:$0xff] %vm262_vm0, %v1774_v0  ;;  %320 = vst.msk [vmem:[#allocation2 + $0x1c8] sm:$0xff] %vm262_vm0, %v1774_v0 }
  0x30   : > { %321 = vst.msk [vmem:[#allocation2 + $0x1d0] sm:$0xff] %vm262_vm0, %v1774_v0  ;;  %322 = vst.msk [vmem:[#allocation2 + $0x1d8] sm:$0xff] %vm262_vm0, %v1774_v0 }
  0x31   : > { %323 = vst.msk [vmem:[#allocation2 + $0x1e0] sm:$0xff] %vm262_vm0, %v1774_v0  ;;  %324 = vst.msk [vmem:[#allocation2 + $0x1e8] sm:$0xff] %vm262_vm0, %v1774_v0 }
  0x32   : > { %325 = vst.msk [vmem:[#allocation2 + $0x1f0] sm:$0xff] %vm262_vm0, %v1774_v0  ;;  %326 = vst.msk [vmem:[#allocation2 + $0x1f8] sm:$0xff] %vm262_vm0, %v1774_v0 }
  0x33 PF: > { %v455_v1 = vld [vmem:[%s1825_s24] sm:$0x3]  ;;  %vm713_vm1 = vcmask 1041408   ;;  %vm616_vm2 = vcmask 31744   ;;  %v1720_v5 = vld [vmem:[%s1820_s21 + $0x8] sm:$0xff]   ;;  %v1722_v7 = vld [vmem:[%s1820_s21 + $0x10] sm:$0xff]  }
  0x34   : > { %v1718_v2 = vld [vmem:[%s1820_s21] sm:$0xff]   ;;  %1691 = vmatprep.subr.msk.bf16.mxu0 %vm713_vm1, %v455_v1  ;;  %1692 = vmatprep.subr.msk.bf16.mxu1 %vm713_vm1, %v455_v1  ;;  %v715_v3 = vsel %vm713_vm1, %v455_v1, 0  ;;  %v1721_v6 = vld [vmem:[%s1820_s21 + $0x88] sm:$0xff]   ;;  %v1723_v8 = vld [vmem:[%s1820_s21 + $0x90] sm:$0xff]   ;;  %vm1070_vm3 = vcmask 523264   ;;  %p1583_p6 = scmp.ne.s32.totalorder %s1764_s12, 8 }
  0x35   : > { %1624 = vmatpush3.bf16.msra.mxu0 %v715_v3  ;;  %1690 = vmatpush3.bf16.msra.mxu1 %v715_v3  ;;  %v1719_v4 = vld [vmem:[%s1820_s21 + $0x80] sm:$0xff]   ;;  %v1724_v9 = vld [vmem:[%s1820_s21 + $0x18] sm:$0xff]   ;;  %v1728_v13 = vld [vmem:[%s1820_s21 + $0x28] sm:$0xff]  }
  0x36   : > { %1625 = vmatprep.mubr.msk.bf16.mxu0 %vm616_vm2, %v1718_v2  ;;  %1657 = vmatprep.mubr.msk.bf16.mxu1 %vm616_vm2, %v1719_v4  ;;  %v1725_v10 = vld [vmem:[%s1820_s21 + $0x98] sm:$0xff]   ;;  %v1726_v11 = vld [vmem:[%s1820_s21 + $0x20] sm:$0xff]   ;;  %v1729_v14 = vld [vmem:[%s1820_s21 + $0xa8] sm:$0xff]  }
  0x37   : > { %v1727_v12 = vld [vmem:[%s1820_s21 + $0xa0] sm:$0xff]   ;;  %v1730_v15 = vld [vmem:[%s1820_s21 + $0x30] sm:$0xff]   ;;  %v1732_v17 = vld [vmem:[%s1820_s21 + $0x38] sm:$0xff]  }
  0x38   : > { %1626 = vmatmul.mubr.msk.bf16.vlgmr.msra.gmra.mxu0 %vm616_vm2, %v1720_v5  ;;  %1658 = vmatmul.mubr.msk.bf16.vlgmr.msra.gmra.mxu1 %vm616_vm2, %v1721_v6  ;;  %v1731_v16 = vld [vmem:[%s1820_s21 + $0xb0] sm:$0xff]   ;;  %v1733_v18 = vld [vmem:[%s1820_s21 + $0xb8] sm:$0xff]   ;;  %v1734_v19 = vld [vmem:[%s1820_s21 + $0x40] sm:$0xff]  }
  0x39   : > { %1629 = vmatprep.mubr.msk.bf16.mxu0 %vm616_vm2, %v1722_v7  ;;  %1661 = vmatprep.mubr.msk.bf16.mxu1 %vm616_vm2, %v1723_v8  ;;  %v1735_v20 = vld [vmem:[%s1820_s21 + $0xc0] sm:$0xff]   ;;  %v1736_v21 = vld [vmem:[%s1820_s21 + $0x48] sm:$0xff]   ;;  %v1738_v23 = vld [vmem:[%s1820_s21 + $0x50] sm:$0xff]  }
  0x3a   : > { %v1737_v22 = vld [vmem:[%s1820_s21 + $0xc8] sm:$0xff]   ;;  %v1739_v24 = vld [vmem:[%s1820_s21 + $0xd0] sm:$0xff]   ;;  %v1740_v25 = vld [vmem:[%s1820_s21 + $0x58] sm:$0xff]  }
  0x3b   : > { %v1741_v26 = vld [vmem:[%s1820_s21 + $0xd8] sm:$0xff]   ;;  %v1742_v27 = vld [vmem:[%s1820_s21 + $0x60] sm:$0xff]   ;;  %v1744_v29 = vld [vmem:[%s1820_s21 + $0x68] sm:$0xff]  }
  0x3c   : > { %v1743_v28 = vld [vmem:[%s1820_s21 + $0xe0] sm:$0xff]   ;;  %v1745_v30 = vld [vmem:[%s1820_s21 + $0xe8] sm:$0xff]   ;;  %v1746_v31 = vld [vmem:[%s1820_s21 + $0x70] sm:$0xff]  }
  0x3d   : > { %v1747_v32 = vld [vmem:[%s1820_s21 + $0xf0] sm:$0xff]   ;;  %v1748_v33 = vld [vmem:[%s1820_s21 + $0x78] sm:$0xff]   ;;  %v327_v38 = vld [vmem:[#allocation2] sm:$0xff] }
  0x3e   : > { %v1749_v34 = vld [vmem:[%s1820_s21 + $0xf8] sm:$0xff]   ;;  %v329_v35 = vld [vmem:[#allocation2 + $0x10] sm:$0xff]  ;;  %v359_v41 = vld [vmem:[#allocation2 + $0x100] sm:$0xff] }
  0x3f   : > { %v361_v36 = vld [vmem:[#allocation2 + $0x110] sm:$0xff]  ;;  %v330_v44 = vld [vmem:[#allocation2 + $0x18] sm:$0xff]  ;;  %v328_v50 = vld [vmem:[#allocation2 + $0x8] sm:$0xff] }
  0x40   : > { %1630 = vmatmul.mubr.msk.bf16.gmra.mxu0 %vm616_vm2, %v1724_v9  ;;  %1662 = vmatmul.mubr.msk.bf16.gmra.mxu1 %vm616_vm2, %v1725_v10  ;;  %v362_v47 = vld [vmem:[#allocation2 + $0x118] sm:$0xff]  ;;  %v360_v53 = vld [vmem:[#allocation2 + $0x108] sm:$0xff]  ;;  %v333_v56 = vld [vmem:[#allocation2 + $0x30] sm:$0xff] }
  0x41   : > { %1633 = vmatprep.mubr.msk.bf16.mxu0 %vm616_vm2, %v1726_v11  ;;  %1665 = vmatprep.mubr.msk.bf16.mxu1 %vm616_vm2, %v1727_v12  ;;  %v365_v59 = vld [vmem:[#allocation2 + $0x130] sm:$0xff]  ;;  %v331_v62 = vld [vmem:[#allocation2 + $0x20] sm:$0xff]  ;;  %v334_v4 = vld [vmem:[#allocation2 + $0x38] sm:$0xff] }
  0x42   : > { %v363_v1 = vld [vmem:[#allocation2 + $0x120] sm:$0xff]  ;;  %v366_v7 = vld [vmem:[#allocation2 + $0x138] sm:$0xff]  ;;  %v332_v10 = vld [vmem:[#allocation2 + $0x28] sm:$0xff] }
  0x48   : > { %1634 = vmatmul.mubr.msk.bf16.gmra.mxu0 %vm616_vm2, %v1728_v13  ;;  %1666 = vmatmul.mubr.msk.bf16.gmra.mxu1 %vm616_vm2, %v1729_v14  ;;  %v364_v13 = vld [vmem:[#allocation2 + $0x128] sm:$0xff] }
  0x49   : > { %1637 = vmatprep.mubr.msk.bf16.mxu0 %vm616_vm2, %v1730_v15  ;;  %1669 = vmatprep.mubr.msk.bf16.mxu1 %vm616_vm2, %v1731_v16  ;;  %v337_v16 = vld [vmem:[#allocation2 + $0x50] sm:$0xff] }
  0x50   : > { %1638 = vmatmul.mubr.msk.bf16.gmra.mxu0 %vm616_vm2, %v1732_v17  ;;  %1670 = vmatmul.mubr.msk.bf16.gmra.mxu1 %vm616_vm2, %v1733_v18 }
  0x51   : > { %1641 = vmatprep.mubr.msk.bf16.mxu0 %vm616_vm2, %v1734_v19  ;;  %1673 = vmatprep.mubr.msk.bf16.mxu1 %vm616_vm2, %v1735_v20  ;;  %v369_v19 = vld [vmem:[#allocation2 + $0x150] sm:$0xff] }
  0x58   : > { %1642 = vmatmul.mubr.msk.bf16.gmra.mxu0 %vm616_vm2, %v1736_v21  ;;  %1674 = vmatmul.mubr.msk.bf16.gmra.mxu1 %vm616_vm2, %v1737_v22  ;;  %v335_v22 = vld [vmem:[#allocation2 + $0x40] sm:$0xff] }
  0x59   : > { %1645 = vmatprep.mubr.msk.bf16.mxu0 %vm616_vm2, %v1738_v23  ;;  %1677 = vmatprep.mubr.msk.bf16.mxu1 %vm616_vm2, %v1739_v24 }
  0x60   : > { %1646 = vmatmul.mubr.msk.bf16.gmra.mxu0 %vm616_vm2, %v1740_v25  ;;  %1678 = vmatmul.mubr.msk.bf16.gmra.mxu1 %vm616_vm2, %v1741_v26  ;;  %v367_v25 = vld [vmem:[#allocation2 + $0x140] sm:$0xff] }
  0x61   : > { %1649 = vmatprep.mubr.msk.bf16.mxu0 %vm616_vm2, %v1742_v27  ;;  %1681 = vmatprep.mubr.msk.bf16.mxu1 %vm616_vm2, %v1743_v28  ;;  %v338_v28 = vld [vmem:[#allocation2 + $0x58] sm:$0xff] }
  0x68   : > { %1650 = vmatmul.mubr.msk.bf16.gmra.mxu0 %vm616_vm2, %v1744_v29  ;;  %1682 = vmatmul.mubr.msk.bf16.gmra.mxu1 %vm616_vm2, %v1745_v30 }
  0x69   : > { %1653 = vmatprep.mubr.msk.bf16.mxu0 %vm616_vm2, %v1746_v31  ;;  %1685 = vmatprep.mubr.msk.bf16.mxu1 %vm616_vm2, %v1747_v32  ;;  %v370_v31 = vld [vmem:[#allocation2 + $0x158] sm:$0xff] }
  0x70   : > { %1654 = vmatmul.mubr.msk.bf16.gmra.mxu0 %vm616_vm2, %v1748_v33  ;;  %1686 = vmatmul.mubr.msk.bf16.gmra.mxu1 %vm616_vm2, %v1749_v34  ;;  %v336_v34 = vld [vmem:[#allocation2 + $0x48] sm:$0xff] }
  0xf8   : > { %v1627_v37 = vpop.f32.mrf.mxu0  ;;  %v1659_v40 = vpop.f32.mrf.mxu1 }
  0xf9   : > { %v1008_v39 = vadd.f32 %v1627_v37, %v329_v35  ;;  %v1040_v42 = vadd.f32 %v1659_v40, %v361_v36  ;;  %v368_v37 = vld [vmem:[#allocation2 + $0x148] sm:$0xff]  ;;  %v341_v40 = vld [vmem:[#allocation2 + $0x70] sm:$0xff] }
  0xfa   : > { %v751_v43 = vpop.f32.mrf.mxu0  ;;  %v879_v46 = vpop.f32.mrf.mxu1 }
  0xfb   : > { %1073 = vst.msk [vmem:[#allocation2 + $0x10] sm:$0xff] %vm1070_vm3, %v1008_v39  ;;  %v1006_v45 = vadd.f32 %v751_v43, %v327_v38  ;;  %1105 = vst.msk [vmem:[#allocation2 + $0x110] sm:$0xff] %vm1070_vm3, %v1040_v42  ;;  %v1038_v48 = vadd.f32 %v879_v46, %v359_v41  ;;  %v373_v43 = vld [vmem:[#allocation2 + $0x170] sm:$0xff]  ;;  %v339_v46 = vld [vmem:[#allocation2 + $0x60] sm:$0xff] }
  0xfc   : > { %v1628_v49 = vpop.f32.mrf.mxu0  ;;  %v1660_v52 = vpop.f32.mrf.mxu1 }
  0xfd   : > { %1071 = vst.msk [vmem:[#allocation2] sm:$0xff] %vm1070_vm3, %v1006_v45  ;;  %v1009_v51 = vadd.f32 %v1628_v49, %v330_v44  ;;  %1103 = vst.msk [vmem:[#allocation2 + $0x100] sm:$0xff] %vm1070_vm3, %v1038_v48  ;;  %v1041_v54 = vadd.f32 %v1660_v52, %v362_v47  ;;  %v371_v49 = vld [vmem:[#allocation2 + $0x160] sm:$0xff]  ;;  %v342_v52 = vld [vmem:[#allocation2 + $0x78] sm:$0xff] }
  0xfe   : > { %v754_v55 = vpop.f32.mrf.mxu0  ;;  %v882_v58 = vpop.f32.mrf.mxu1 }
  0xff   : > { %1074 = vst.msk [vmem:[#allocation2 + $0x18] sm:$0xff] %vm1070_vm3, %v1009_v51  ;;  %v1007_v57 = vadd.f32 %v754_v55, %v328_v50  ;;  %1106 = vst.msk [vmem:[#allocation2 + $0x118] sm:$0xff] %vm1070_vm3, %v1041_v54  ;;  %v1039_v60 = vadd.f32 %v882_v58, %v360_v53  ;;  %v374_v55 = vld [vmem:[#allocation2 + $0x178] sm:$0xff]  ;;  %v340_v58 = vld [vmem:[#allocation2 + $0x68] sm:$0xff] }
 0x100   : > { %v1631_v61 = vpop.f32.mrf.mxu0  ;;  %v1663_v0 = vpop.f32.mrf.mxu1 }
 0x101   : > { %1072 = vst.msk [vmem:[#allocation2 + $0x8] sm:$0xff] %vm1070_vm3, %v1007_v57  ;;  %v1012_v63 = vadd.f32 %v1631_v61, %v333_v56  ;;  %1104 = vst.msk [vmem:[#allocation2 + $0x108] sm:$0xff] %vm1070_vm3, %v1039_v60  ;;  %v1044_v2 = vadd.f32 %v1663_v0, %v365_v59  ;;  %v372_v61 = vld [vmem:[#allocation2 + $0x168] sm:$0xff]  ;;  %v345_v0 = vld [vmem:[#allocation2 + $0x90] sm:$0xff] }
 0x102   : > { %v767_v3 = vpop.f32.mrf.mxu0  ;;  %v895_v6 = vpop.f32.mrf.mxu1 }
 0x103   : > { %1077 = vst.msk [vmem:[#allocation2 + $0x30] sm:$0xff] %vm1070_vm3, %v1012_v63  ;;  %v1010_v5 = vadd.f32 %v767_v3, %v331_v62  ;;  %1109 = vst.msk [vmem:[#allocation2 + $0x130] sm:$0xff] %vm1070_vm3, %v1044_v2  ;;  %v1042_v8 = vadd.f32 %v895_v6, %v363_v1  ;;  %v377_v3 = vld [vmem:[#allocation2 + $0x190] sm:$0xff]  ;;  %v343_v6 = vld [vmem:[#allocation2 + $0x80] sm:$0xff] }
 0x104   : > { %v1632_v9 = vpop.f32.mrf.mxu0  ;;  %v1664_v12 = vpop.f32.mrf.mxu1 }
 0x105   : > { %1075 = vst.msk [vmem:[#allocation2 + $0x20] sm:$0xff] %vm1070_vm3, %v1010_v5  ;;  %v1013_v11 = vadd.f32 %v1632_v9, %v334_v4  ;;  %1107 = vst.msk [vmem:[#allocation2 + $0x120] sm:$0xff] %vm1070_vm3, %v1042_v8  ;;  %v1045_v14 = vadd.f32 %v1664_v12, %v366_v7  ;;  %v375_v9 = vld [vmem:[#allocation2 + $0x180] sm:$0xff]  ;;  %v346_v12 = vld [vmem:[#allocation2 + $0x98] sm:$0xff] }
 0x106   : > { %v770_v15 = vpop.f32.mrf.mxu0  ;;  %v898_v18 = vpop.f32.mrf.mxu1 }
 0x107   : > { %1078 = vst.msk [vmem:[#allocation2 + $0x38] sm:$0xff] %vm1070_vm3, %v1013_v11  ;;  %v1011_v17 = vadd.f32 %v770_v15, %v332_v10  ;;  %1110 = vst.msk [vmem:[#allocation2 + $0x138] sm:$0xff] %vm1070_vm3, %v1045_v14  ;;  %v1043_v20 = vadd.f32 %v898_v18, %v364_v13  ;;  %v378_v15 = vld [vmem:[#allocation2 + $0x198] sm:$0xff]  ;;  %v344_v18 = vld [vmem:[#allocation2 + $0x88] sm:$0xff] }
 0x108   : > { %v1635_v21 = vpop.f32.mrf.mxu0  ;;  %v1667_v24 = vpop.f32.mrf.mxu1 }
 0x109   : > { %1076 = vst.msk [vmem:[#allocation2 + $0x28] sm:$0xff] %vm1070_vm3, %v1011_v17  ;;  %v1016_v23 = vadd.f32 %v1635_v21, %v337_v16  ;;  %1108 = vst.msk [vmem:[#allocation2 + $0x128] sm:$0xff] %vm1070_vm3, %v1043_v20  ;;  %v1048_v26 = vadd.f32 %v1667_v24, %v369_v19  ;;  %v376_v21 = vld [vmem:[#allocation2 + $0x188] sm:$0xff]  ;;  %v349_v24 = vld [vmem:[#allocation2 + $0xb0] sm:$0xff] }
 0x10a   : > { %v783_v27 = vpop.f32.mrf.mxu0  ;;  %v911_v30 = vpop.f32.mrf.mxu1 }
 0x10b   : > { %1081 = vst.msk [vmem:[#allocation2 + $0x50] sm:$0xff] %vm1070_vm3, %v1016_v23  ;;  %v1014_v29 = vadd.f32 %v783_v27, %v335_v22  ;;  %1113 = vst.msk [vmem:[#allocation2 + $0x150] sm:$0xff] %vm1070_vm3, %v1048_v26  ;;  %v1046_v32 = vadd.f32 %v911_v30, %v367_v25  ;;  %v381_v27 = vld [vmem:[#allocation2 + $0x1b0] sm:$0xff]  ;;  %v347_v30 = vld [vmem:[#allocation2 + $0xa0] sm:$0xff] }
 0x10c   : > { %v1636_v33 = vpop.f32.mrf.mxu0  ;;  %v1668_v36 = vpop.f32.mrf.mxu1 }
 0x10d   : > { %1079 = vst.msk [vmem:[#allocation2 + $0x40] sm:$0xff] %vm1070_vm3, %v1014_v29  ;;  %v1017_v35 = vadd.f32 %v1636_v33, %v338_v28  ;;  %1111 = vst.msk [vmem:[#allocation2 + $0x140] sm:$0xff] %vm1070_vm3, %v1046_v32  ;;  %v1049_v38 = vadd.f32 %v1668_v36, %v370_v31  ;;  %v379_v33 = vld [vmem:[#allocation2 + $0x1a0] sm:$0xff]  ;;  %v350_v36 = vld [vmem:[#allocation2 + $0xb8] sm:$0xff] }
 0x10e   : > { %v786_v39 = vpop.f32.mrf.mxu0  ;;  %v914_v42 = vpop.f32.mrf.mxu1 }
 0x10f   : > { %1082 = vst.msk [vmem:[#allocation2 + $0x58] sm:$0xff] %vm1070_vm3, %v1017_v35  ;;  %v1015_v41 = vadd.f32 %v786_v39, %v336_v34  ;;  %1114 = vst.msk [vmem:[#allocation2 + $0x158] sm:$0xff] %vm1070_vm3, %v1049_v38  ;;  %v1047_v44 = vadd.f32 %v914_v42, %v368_v37  ;;  %v382_v39 = vld [vmem:[#allocation2 + $0x1b8] sm:$0xff]  ;;  %v348_v42 = vld [vmem:[#allocation2 + $0xa8] sm:$0xff] }
 0x110   : > { %v1639_v45 = vpop.f32.mrf.mxu0  ;;  %v1671_v48 = vpop.f32.mrf.mxu1 }
 0x111   : > { %1080 = vst.msk [vmem:[#allocation2 + $0x48] sm:$0xff] %vm1070_vm3, %v1015_v41  ;;  %v1020_v47 = vadd.f32 %v1639_v45, %v341_v40  ;;  %1112 = vst.msk [vmem:[#allocation2 + $0x148] sm:$0xff] %vm1070_vm3, %v1047_v44  ;;  %v1052_v50 = vadd.f32 %v1671_v48, %v373_v43  ;;  %v380_v45 = vld [vmem:[#allocation2 + $0x1a8] sm:$0xff]  ;;  %v353_v48 = vld [vmem:[#allocation2 + $0xd0] sm:$0xff] }
 0x112   : > { %v799_v51 = vpop.f32.mrf.mxu0  ;;  %v927_v54 = vpop.f32.mrf.mxu1 }
 0x113   : > { %1085 = vst.msk [vmem:[#allocation2 + $0x70] sm:$0xff] %vm1070_vm3, %v1020_v47  ;;  %v1018_v53 = vadd.f32 %v799_v51, %v339_v46  ;;  %1117 = vst.msk [vmem:[#allocation2 + $0x170] sm:$0xff] %vm1070_vm3, %v1052_v50  ;;  %v1050_v56 = vadd.f32 %v927_v54, %v371_v49  ;;  %v385_v51 = vld [vmem:[#allocation2 + $0x1d0] sm:$0xff]  ;;  %v351_v54 = vld [vmem:[#allocation2 + $0xc0] sm:$0xff] }
 0x114   : > { %v1640_v57 = vpop.f32.mrf.mxu0  ;;  %v1672_v60 = vpop.f32.mrf.mxu1 }
 0x115   : > { %1083 = vst.msk [vmem:[#allocation2 + $0x60] sm:$0xff] %vm1070_vm3, %v1018_v53  ;;  %v1021_v59 = vadd.f32 %v1640_v57, %v342_v52  ;;  %1115 = vst.msk [vmem:[#allocation2 + $0x160] sm:$0xff] %vm1070_vm3, %v1050_v56  ;;  %v1053_v62 = vadd.f32 %v1672_v60, %v374_v55  ;;  %v383_v57 = vld [vmem:[#allocation2 + $0x1c0] sm:$0xff]  ;;  %v354_v60 = vld [vmem:[#allocation2 + $0xd8] sm:$0xff] }
 0x116   : > { %v802_v63 = vpop.f32.mrf.mxu0  ;;  %v930_v2 = vpop.f32.mrf.mxu1 }
 0x117   : > { %1086 = vst.msk [vmem:[#allocation2 + $0x78] sm:$0xff] %vm1070_vm3, %v1021_v59  ;;  %v1019_v1 = vadd.f32 %v802_v63, %v340_v58  ;;  %1118 = vst.msk [vmem:[#allocation2 + $0x178] sm:$0xff] %vm1070_vm3, %v1053_v62  ;;  %v1051_v4 = vadd.f32 %v930_v2, %v372_v61  ;;  %v386_v63 = vld [vmem:[#allocation2 + $0x1d8] sm:$0xff]  ;;  %v352_v2 = vld [vmem:[#allocation2 + $0xc8] sm:$0xff] }
 0x118   : > { %v1643_v5 = vpop.f32.mrf.mxu0  ;;  %v1675_v8 = vpop.f32.mrf.mxu1 }
 0x119   : > { %1084 = vst.msk [vmem:[#allocation2 + $0x68] sm:$0xff] %vm1070_vm3, %v1019_v1  ;;  %v1024_v7 = vadd.f32 %v1643_v5, %v345_v0  ;;  %1116 = vst.msk [vmem:[#allocation2 + $0x168] sm:$0xff] %vm1070_vm3, %v1051_v4  ;;  %v1056_v10 = vadd.f32 %v1675_v8, %v377_v3  ;;  %v384_v5 = vld [vmem:[#allocation2 + $0x1c8] sm:$0xff]  ;;  %v357_v8 = vld [vmem:[#allocation2 + $0xf0] sm:$0xff] }
 0x11a   : > { %v815_v11 = vpop.f32.mrf.mxu0  ;;  %v943_v14 = vpop.f32.mrf.mxu1 }
 0x11b   : > { %1089 = vst.msk [vmem:[#allocation2 + $0x90] sm:$0xff] %vm1070_vm3, %v1024_v7  ;;  %v1022_v13 = vadd.f32 %v815_v11, %v343_v6  ;;  %1121 = vst.msk [vmem:[#allocation2 + $0x190] sm:$0xff] %vm1070_vm3, %v1056_v10  ;;  %v1054_v16 = vadd.f32 %v943_v14, %v375_v9  ;;  %v389_v11 = vld [vmem:[#allocation2 + $0x1f0] sm:$0xff]  ;;  %v355_v14 = vld [vmem:[#allocation2 + $0xe0] sm:$0xff] }
 0x11c   : > { %v1644_v17 = vpop.f32.mrf.mxu0  ;;  %v1676_v20 = vpop.f32.mrf.mxu1 }
 0x11d   : > { %1087 = vst.msk [vmem:[#allocation2 + $0x80] sm:$0xff] %vm1070_vm3, %v1022_v13  ;;  %v1025_v19 = vadd.f32 %v1644_v17, %v346_v12  ;;  %1119 = vst.msk [vmem:[#allocation2 + $0x180] sm:$0xff] %vm1070_vm3, %v1054_v16  ;;  %v1057_v22 = vadd.f32 %v1676_v20, %v378_v15  ;;  %v387_v17 = vld [vmem:[#allocation2 + $0x1e0] sm:$0xff]  ;;  %v358_v20 = vld [vmem:[#allocation2 + $0xf8] sm:$0xff] }
 0x11e   : > { %v818_v23 = vpop.f32.mrf.mxu0  ;;  %v946_v26 = vpop.f32.mrf.mxu1 }
 0x11f   : > { %1090 = vst.msk [vmem:[#allocation2 + $0x98] sm:$0xff] %vm1070_vm3, %v1025_v19  ;;  %v1023_v25 = vadd.f32 %v818_v23, %v344_v18  ;;  %1122 = vst.msk [vmem:[#allocation2 + $0x198] sm:$0xff] %vm1070_vm3, %v1057_v22  ;;  %v1055_v28 = vadd.f32 %v946_v26, %v376_v21  ;;  %v390_v23 = vld [vmem:[#allocation2 + $0x1f8] sm:$0xff]  ;;  %v356_v26 = vld [vmem:[#allocation2 + $0xe8] sm:$0xff] }
 0x120   : > { %v1647_v29 = vpop.f32.mrf.mxu0  ;;  %v1679_v32 = vpop.f32.mrf.mxu1 }
 0x121   : > { %1088 = vst.msk [vmem:[#allocation2 + $0x88] sm:$0xff] %vm1070_vm3, %v1023_v25  ;;  %v1028_v31 = vadd.f32 %v1647_v29, %v349_v24  ;;  %1120 = vst.msk [vmem:[#allocation2 + $0x188] sm:$0xff] %vm1070_vm3, %v1055_v28  ;;  %v1060_v34 = vadd.f32 %v1679_v32, %v381_v27  ;;  %v388_v29 = vld [vmem:[#allocation2 + $0x1e8] sm:$0xff] }
 0x122   : > { %v831_v35 = vpop.f32.mrf.mxu0  ;;  %v959_v38 = vpop.f32.mrf.mxu1 }
 0x123   : > { %1093 = vst.msk [vmem:[#allocation2 + $0xb0] sm:$0xff] %vm1070_vm3, %v1028_v31  ;;  %v1026_v37 = vadd.f32 %v831_v35, %v347_v30  ;;  %1125 = vst.msk [vmem:[#allocation2 + $0x1b0] sm:$0xff] %vm1070_vm3, %v1060_v34  ;;  %v1058_v40 = vadd.f32 %v959_v38, %v379_v33 }
 0x124   : > { %v1648_v41 = vpop.f32.mrf.mxu0  ;;  %v1680_v44 = vpop.f32.mrf.mxu1 }
 0x125   : > { %1091 = vst.msk [vmem:[#allocation2 + $0xa0] sm:$0xff] %vm1070_vm3, %v1026_v37  ;;  %v1029_v43 = vadd.f32 %v1648_v41, %v350_v36  ;;  %1123 = vst.msk [vmem:[#allocation2 + $0x1a0] sm:$0xff] %vm1070_vm3, %v1058_v40  ;;  %v1061_v46 = vadd.f32 %v1680_v44, %v382_v39 }
 0x126   : > { %v834_v47 = vpop.f32.mrf.mxu0  ;;  %v962_v50 = vpop.f32.mrf.mxu1 }
 0x127   : > { %1094 = vst.msk [vmem:[#allocation2 + $0xb8] sm:$0xff] %vm1070_vm3, %v1029_v43  ;;  %v1027_v49 = vadd.f32 %v834_v47, %v348_v42  ;;  %1126 = vst.msk [vmem:[#allocation2 + $0x1b8] sm:$0xff] %vm1070_vm3, %v1061_v46  ;;  %v1059_v52 = vadd.f32 %v962_v50, %v380_v45 }
 0x128   : > { %v1651_v53 = vpop.f32.mrf.mxu0  ;;  %v1683_v56 = vpop.f32.mrf.mxu1 }
 0x129   : > { %1092 = vst.msk [vmem:[#allocation2 + $0xa8] sm:$0xff] %vm1070_vm3, %v1027_v49  ;;  %v1032_v55 = vadd.f32 %v1651_v53, %v353_v48  ;;  %1124 = vst.msk [vmem:[#allocation2 + $0x1a8] sm:$0xff] %vm1070_vm3, %v1059_v52  ;;  %v1064_v58 = vadd.f32 %v1683_v56, %v385_v51 }
 0x12a   : > { %v847_v59 = vpop.f32.mrf.mxu0  ;;  %v975_v62 = vpop.f32.mrf.mxu1 }
 0x12b   : > { %1097 = vst.msk [vmem:[#allocation2 + $0xd0] sm:$0xff] %vm1070_vm3, %v1032_v55  ;;  %v1030_v61 = vadd.f32 %v847_v59, %v351_v54  ;;  %1129 = vst.msk [vmem:[#allocation2 + $0x1d0] sm:$0xff] %vm1070_vm3, %v1064_v58  ;;  %v1062_v0 = vadd.f32 %v975_v62, %v383_v57 }
 0x12c   : > { %v1652_v1 = vpop.f32.mrf.mxu0  ;;  %v1684_v4 = vpop.f32.mrf.mxu1 }
 0x12d   : > { %1095 = vst.msk [vmem:[#allocation2 + $0xc0] sm:$0xff] %vm1070_vm3, %v1030_v61  ;;  %v1033_v3 = vadd.f32 %v1652_v1, %v354_v60  ;;  %1127 = vst.msk [vmem:[#allocation2 + $0x1c0] sm:$0xff] %vm1070_vm3, %v1062_v0  ;;  %v1065_v6 = vadd.f32 %v1684_v4, %v386_v63 }
 0x12e   : > { %v850_v7 = vpop.f32.mrf.mxu0  ;;  %v978_v10 = vpop.f32.mrf.mxu1 }
 0x12f   : > { %1098 = vst.msk [vmem:[#allocation2 + $0xd8] sm:$0xff] %vm1070_vm3, %v1033_v3  ;;  %v1031_v9 = vadd.f32 %v850_v7, %v352_v2  ;;  %1130 = vst.msk [vmem:[#allocation2 + $0x1d8] sm:$0xff] %vm1070_vm3, %v1065_v6  ;;  %v1063_v12 = vadd.f32 %v978_v10, %v384_v5 }
 0x130   : > { %v1655_v13 = vpop.f32.mrf.mxu0  ;;  %v1687_v16 = vpop.f32.mrf.mxu1 }
 0x131   : > { %1096 = vst.msk [vmem:[#allocation2 + $0xc8] sm:$0xff] %vm1070_vm3, %v1031_v9  ;;  %v1036_v15 = vadd.f32 %v1655_v13, %v357_v8  ;;  %1128 = vst.msk [vmem:[#allocation2 + $0x1c8] sm:$0xff] %vm1070_vm3, %v1063_v12  ;;  %v1068_v18 = vadd.f32 %v1687_v16, %v389_v11 }
 0x132   : > { %v863_v19 = vpop.f32.mrf.mxu0  ;;  %v991_v22 = vpop.f32.mrf.mxu1 }
 0x133   : > { %1101 = vst.msk [vmem:[#allocation2 + $0xf0] sm:$0xff] %vm1070_vm3, %v1036_v15  ;;  %v1034_v21 = vadd.f32 %v863_v19, %v355_v14  ;;  %1133 = vst.msk [vmem:[#allocation2 + $0x1f0] sm:$0xff] %vm1070_vm3, %v1068_v18  ;;  %v1066_v24 = vadd.f32 %v991_v22, %v387_v17 }
 0x134   : > { %v1656_v25 = vpop.f32.mrf.mxu0  ;;  %v1688_v28 = vpop.f32.mrf.mxu1 }
 0x135   : > { %1099 = vst.msk [vmem:[#allocation2 + $0xe0] sm:$0xff] %vm1070_vm3, %v1034_v21  ;;  %v1037_v27 = vadd.f32 %v1656_v25, %v358_v20  ;;  %1131 = vst.msk [vmem:[#allocation2 + $0x1e0] sm:$0xff] %vm1070_vm3, %v1066_v24  ;;  %v1069_v30 = vadd.f32 %v1688_v28, %v390_v23  ;;  %1138 = sbr.rel (%p1583_p6) target bundleno = 352 (0x160), region = 40 }
 0x136   : > { %v866_v31 = vpop.f32.mrf.mxu0  ;;  %v994_v33 = vpop.f32.mrf.mxu1 }
 0x137   : > { %1102 = vst.msk [vmem:[#allocation2 + $0xf8] sm:$0xff] %vm1070_vm3, %v1037_v27  ;;  %v1035_v32 = vadd.f32 %v866_v31, %v356_v26  ;;  %1134 = vst.msk [vmem:[#allocation2 + $0x1f8] sm:$0xff] %vm1070_vm3, %v1069_v30  ;;  %v1067_v34 = vadd.f32 %v994_v33, %v388_v29 }
 0x139   : > { %1100 = vst.msk [vmem:[#allocation2 + $0xe8] sm:$0xff] %vm1070_vm3, %v1035_v32  ;;  %1132 = vst.msk [vmem:[#allocation2 + $0x1e8] sm:$0xff] %vm1070_vm3, %v1067_v34 }
 0x13a   : > { %v1139_v35 = vld [vmem:[#allocation2] sm:$0xff]  ;;  %v1140_v37 = vld [vmem:[#allocation2 + $0x8] sm:$0xff]  ;;  %v1141_v40 = vld [vmem:[#allocation2 + $0x10] sm:$0xff] }
 0x13b   : > { %v2089_v36 = vld [vmem:[%s2422_s2] ss:$0 sm:$0xff]  ;;  %v1142_v41 = vld [vmem:[#allocation2 + $0x18] sm:$0xff]  ;;  %v1144_v46 = vld [vmem:[#allocation2 + $0x28] sm:$0xff] }
 0x13c   : > { %v1210_v38 = vadd.f32 %v2089_v36, %v1139_v35  ;;  %v1211_v39 = vadd.f32 %v2089_v36, %v1140_v37  ;;  %v1143_v42 = vld [vmem:[#allocation2 + $0x20] sm:$0xff]  ;;  %v1212_v43 = vadd.f32 %v2089_v36, %v1141_v40  ;;  %v1213_v44 = vadd.f32 %v2089_v36, %v1142_v41  ;;  %v1145_v47 = vld [vmem:[#allocation2 + $0x30] sm:$0xff]  ;;  %v1146_v48 = vld [vmem:[#allocation2 + $0x38] sm:$0xff] }
 0x13d   : > { %v1214_v45 = vadd.f32 %v2089_v36, %v1143_v42  ;;  %v1215_v51 = vadd.f32 %v2089_v36, %v1144_v46  ;;  %v1216_v52 = vadd.f32 %v2089_v36, %v1145_v47  ;;  %v1147_v53 = vld [vmem:[#allocation2 + $0x40] sm:$0xff]  ;;  %v1148_v54 = vld [vmem:[#allocation2 + $0x48] sm:$0xff]  ;;  %v1149_v55 = vld [vmem:[#allocation2 + $0x50] sm:$0xff]  ;;  %v1217_v59 = vadd.f32 %v2089_v36, %v1146_v48 }
 0x13e   : > { %v1274_v49 = vmax.f32 %v1210_v38, 0.0  ;;  %v1275_v50 = vmax.f32 %v1211_v39, 0.0  ;;  %v1276_v56 = vmax.f32 %v1212_v43, 0.0  ;;  %v1277_v57 = vmax.f32 %v1213_v44, 0.0  ;;  %v1150_v60 = vld [vmem:[#allocation2 + $0x58] sm:$0xff]  ;;  %v1151_v61 = vld [vmem:[#allocation2 + $0x60] sm:$0xff] }
 0x13f   : > { %v1278_v58 = vmax.f32 %v1214_v45, 0.0  ;;  %v1152_v62 = vld [vmem:[#allocation2 + $0x68] sm:$0xff]  ;;  %v1279_v63 = vmax.f32 %v1215_v51, 0.0  ;;  %v1280_v0 = vmax.f32 %v1216_v52, 0.0  ;;  %v1218_v1 = vadd.f32 %v2089_v36, %v1147_v53  ;;  %v1153_v3 = vld [vmem:[#allocation2 + $0x70] sm:$0xff]  ;;  %v1154_v4 = vld [vmem:[#allocation2 + $0x78] sm:$0xff] }
 0x140   : > { %1338 = vst.msk [vmem:[%s2423_s3] sm:$0xff] %vm1070_vm3, %v1274_v49  ;;  %1339 = vst.msk [vmem:[%s2423_s3 + $0x8] sm:$0xff] %vm1070_vm3, %v1275_v50  ;;  %v1219_v2 = vadd.f32 %v2089_v36, %v1148_v54  ;;  %v1281_v5 = vmax.f32 %v1217_v59, 0.0  ;;  %v1220_v6 = vadd.f32 %v2089_v36, %v1149_v55  ;;  %v1221_v7 = vadd.f32 %v2089_v36, %v1150_v60  ;;  %v1155_v9 = vld [vmem:[#allocation2 + $0x80] sm:$0xff]  ;;  %v1156_v10 = vld [vmem:[#allocation2 + $0x88] sm:$0xff] }
 0x141   : > { %1340 = vst.msk [vmem:[%s2423_s3 + $0x10] sm:$0xff] %vm1070_vm3, %v1276_v56  ;;  %1341 = vst.msk [vmem:[%s2423_s3 + $0x18] sm:$0xff] %vm1070_vm3, %v1277_v57  ;;  %v1222_v8 = vadd.f32 %v2089_v36, %v1151_v61  ;;  %v1282_v11 = vmax.f32 %v1218_v1, 0.0  ;;  %v1223_v13 = vadd.f32 %v2089_v36, %v1152_v62  ;;  %v1224_v14 = vadd.f32 %v2089_v36, %v1153_v3  ;;  %v1157_v15 = vld [vmem:[#allocation2 + $0x90] sm:$0xff]  ;;  %v1158_v16 = vld [vmem:[#allocation2 + $0x98] sm:$0xff] }
 0x142   : > { %1342 = vst.msk [vmem:[%s2423_s3 + $0x20] sm:$0xff] %vm1070_vm3, %v1278_v58  ;;  %1343 = vst.msk [vmem:[%s2423_s3 + $0x28] sm:$0xff] %vm1070_vm3, %v1279_v63  ;;  %v1283_v12 = vmax.f32 %v1219_v2, 0.0  ;;  %v1159_v17 = vld [vmem:[#allocation2 + $0xa0] sm:$0xff]  ;;  %v1284_v18 = vmax.f32 %v1220_v6, 0.0  ;;  %v1285_v19 = vmax.f32 %v1221_v7, 0.0  ;;  %v1225_v21 = vadd.f32 %v2089_v36, %v1154_v4 }
 0x143   : > { %1344 = vst.msk [vmem:[%s2423_s3 + $0x30] sm:$0xff] %vm1070_vm3, %v1280_v0  ;;  %1345 = vst.msk [vmem:[%s2423_s3 + $0x38] sm:$0xff] %vm1070_vm3, %v1281_v5  ;;  %v1286_v20 = vmax.f32 %v1222_v8, 0.0  ;;  %v1160_v22 = vld [vmem:[#allocation2 + $0xa8] sm:$0xff]  ;;  %v1161_v23 = vld [vmem:[#allocation2 + $0xb0] sm:$0xff]  ;;  %v1287_v24 = vmax.f32 %v1223_v13, 0.0  ;;  %v1226_v26 = vadd.f32 %v2089_v36, %v1155_v9  ;;  %v1227_v27 = vadd.f32 %v2089_v36, %v1156_v10 }
 0x144   : > { %1346 = vst.msk [vmem:[%s2423_s3 + $0x40] sm:$0xff] %vm1070_vm3, %v1282_v11  ;;  %1347 = vst.msk [vmem:[%s2423_s3 + $0x48] sm:$0xff] %vm1070_vm3, %v1283_v12  ;;  %v1288_v25 = vmax.f32 %v1224_v14, 0.0  ;;  %v1162_v28 = vld [vmem:[#allocation2 + $0xb8] sm:$0xff]  ;;  %v1289_v29 = vmax.f32 %v1225_v21, 0.0  ;;  %v1228_v30 = vadd.f32 %v2089_v36, %v1157_v15  ;;  %v1229_v31 = vadd.f32 %v2089_v36, %v1158_v16  ;;  %v1163_v33 = vld [vmem:[#allocation2 + $0xc0] sm:$0xff] }
 0x145   : > { %1348 = vst.msk [vmem:[%s2423_s3 + $0x50] sm:$0xff] %vm1070_vm3, %v1284_v18  ;;  %1349 = vst.msk [vmem:[%s2423_s3 + $0x58] sm:$0xff] %vm1070_vm3, %v1285_v19  ;;  %v1230_v32 = vadd.f32 %v2089_v36, %v1159_v17  ;;  %v1164_v34 = vld [vmem:[#allocation2 + $0xc8] sm:$0xff]  ;;  %v1290_v35 = vmax.f32 %v1226_v26, 0.0  ;;  %v1291_v37 = vmax.f32 %v1227_v27, 0.0  ;;  %v1231_v38 = vadd.f32 %v2089_v36, %v1160_v22  ;;  %v1165_v40 = vld [vmem:[#allocation2 + $0xd0] sm:$0xff] }
 0x146   : > { %1350 = vst.msk [vmem:[%s2423_s3 + $0x60] sm:$0xff] %vm1070_vm3, %v1286_v20  ;;  %1351 = vst.msk [vmem:[%s2423_s3 + $0x68] sm:$0xff] %vm1070_vm3, %v1287_v24  ;;  %v1232_v39 = vadd.f32 %v2089_v36, %v1161_v23  ;;  %v1166_v41 = vld [vmem:[#allocation2 + $0xd8] sm:$0xff]  ;;  %v1167_v42 = vld [vmem:[#allocation2 + $0xe0] sm:$0xff]  ;;  %v1292_v43 = vmax.f32 %v1228_v30, 0.0  ;;  %v1293_v44 = vmax.f32 %v1229_v31, 0.0  ;;  %v1233_v46 = vadd.f32 %v2089_v36, %v1162_v28 }
 0x147   : > { %1352 = vst.msk [vmem:[%s2423_s3 + $0x70] sm:$0xff] %vm1070_vm3, %v1288_v25  ;;  %1353 = vst.msk [vmem:[%s2423_s3 + $0x78] sm:$0xff] %vm1070_vm3, %v1289_v29  ;;  %v1294_v45 = vmax.f32 %v1230_v32, 0.0  ;;  %v1168_v47 = vld [vmem:[#allocation2 + $0xe8] sm:$0xff]  ;;  %v1169_v48 = vld [vmem:[#allocation2 + $0xf0] sm:$0xff]  ;;  %v1295_v49 = vmax.f32 %v1231_v38, 0.0  ;;  %v1234_v51 = vadd.f32 %v2089_v36, %v1163_v33  ;;  %v1235_v52 = vadd.f32 %v2089_v36, %v1164_v34 }
 0x148   : > { %1354 = vst.msk [vmem:[%s2423_s3 + $0x80] sm:$0xff] %vm1070_vm3, %v1290_v35  ;;  %1355 = vst.msk [vmem:[%s2423_s3 + $0x88] sm:$0xff] %vm1070_vm3, %v1291_v37  ;;  %v1296_v50 = vmax.f32 %v1232_v39, 0.0  ;;  %v1170_v53 = vld [vmem:[#allocation2 + $0xf8] sm:$0xff]  ;;  %v1297_v54 = vmax.f32 %v1233_v46, 0.0  ;;  %v1236_v55 = vadd.f32 %v2089_v36, %v1165_v40  ;;  %v1237_v56 = vadd.f32 %v2089_v36, %v1166_v41  ;;  %v1171_v58 = vld [vmem:[#allocation2 + $0x100] sm:$0xff] }
 0x149   : > { %1356 = vst.msk [vmem:[%s2423_s3 + $0x90] sm:$0xff] %vm1070_vm3, %v1292_v43  ;;  %1357 = vst.msk [vmem:[%s2423_s3 + $0x98] sm:$0xff] %vm1070_vm3, %v1293_v44  ;;  %v1238_v57 = vadd.f32 %v2089_v36, %v1167_v42  ;;  %v1172_v59 = vld [vmem:[#allocation2 + $0x108] sm:$0xff]  ;;  %v1298_v60 = vmax.f32 %v1234_v51, 0.0  ;;  %v1299_v61 = vmax.f32 %v1235_v52, 0.0  ;;  %v1239_v62 = vadd.f32 %v2089_v36, %v1168_v47  ;;  %v1173_v0 = vld [vmem:[#allocation2 + $0x110] sm:$0xff] }
 0x14a   : > { %1358 = vst.msk [vmem:[%s2423_s3 + $0xa0] sm:$0xff] %vm1070_vm3, %v1294_v45  ;;  %1359 = vst.msk [vmem:[%s2423_s3 + $0xa8] sm:$0xff] %vm1070_vm3, %v1295_v49  ;;  %v1240_v63 = vadd.f32 %v2089_v36, %v1169_v48  ;;  %v1174_v1 = vld [vmem:[#allocation2 + $0x118] sm:$0xff]  ;;  %v1175_v2 = vld [vmem:[#allocation2 + $0x120] sm:$0xff]  ;;  %v1300_v3 = vmax.f32 %v1236_v55, 0.0  ;;  %v1301_v4 = vmax.f32 %v1237_v56, 0.0  ;;  %v1241_v6 = vadd.f32 %v2089_v36, %v1170_v53 }
 0x14b   : > { %1360 = vst.msk [vmem:[%s2423_s3 + $0xb0] sm:$0xff] %vm1070_vm3, %v1296_v50  ;;  %1361 = vst.msk [vmem:[%s2423_s3 + $0xb8] sm:$0xff] %vm1070_vm3, %v1297_v54  ;;  %v1302_v5 = vmax.f32 %v1238_v57, 0.0  ;;  %v1176_v7 = vld [vmem:[#allocation2 + $0x128] sm:$0xff]  ;;  %v1177_v8 = vld [vmem:[#allocation2 + $0x130] sm:$0xff]  ;;  %v1303_v9 = vmax.f32 %v1239_v62, 0.0  ;;  %v1242_v11 = vadd.f32 %v2089_v36, %v1171_v58  ;;  %v1243_v12 = vadd.f32 %v2089_v36, %v1172_v59 }
 0x14c   : > { %1362 = vst.msk [vmem:[%s2423_s3 + $0xc0] sm:$0xff] %vm1070_vm3, %v1298_v60  ;;  %1363 = vst.msk [vmem:[%s2423_s3 + $0xc8] sm:$0xff] %vm1070_vm3, %v1299_v61  ;;  %v1304_v10 = vmax.f32 %v1240_v63, 0.0  ;;  %v1178_v13 = vld [vmem:[#allocation2 + $0x138] sm:$0xff]  ;;  %v1305_v14 = vmax.f32 %v1241_v6, 0.0  ;;  %v1244_v15 = vadd.f32 %v2089_v36, %v1173_v0  ;;  %v1245_v16 = vadd.f32 %v2089_v36, %v1174_v1  ;;  %v1179_v18 = vld [vmem:[#allocation2 + $0x140] sm:$0xff] }
 0x14d   : > { %1364 = vst.msk [vmem:[%s2423_s3 + $0xd0] sm:$0xff] %vm1070_vm3, %v1300_v3  ;;  %1365 = vst.msk [vmem:[%s2423_s3 + $0xd8] sm:$0xff] %vm1070_vm3, %v1301_v4  ;;  %v1246_v17 = vadd.f32 %v2089_v36, %v1175_v2  ;;  %v1180_v19 = vld [vmem:[#allocation2 + $0x148] sm:$0xff]  ;;  %v1306_v20 = vmax.f32 %v1242_v11, 0.0  ;;  %v1307_v21 = vmax.f32 %v1243_v12, 0.0  ;;  %v1247_v22 = vadd.f32 %v2089_v36, %v1176_v7  ;;  %v1181_v24 = vld [vmem:[#allocation2 + $0x150] sm:$0xff] }
 0x14e   : > { %1366 = vst.msk [vmem:[%s2423_s3 + $0xe0] sm:$0xff] %vm1070_vm3, %v1302_v5  ;;  %1367 = vst.msk [vmem:[%s2423_s3 + $0xe8] sm:$0xff] %vm1070_vm3, %v1303_v9  ;;  %v1248_v23 = vadd.f32 %v2089_v36, %v1177_v8  ;;  %v1182_v25 = vld [vmem:[#allocation2 + $0x158] sm:$0xff]  ;;  %v1183_v26 = vld [vmem:[#allocation2 + $0x160] sm:$0xff]  ;;  %v1308_v27 = vmax.f32 %v1244_v15, 0.0  ;;  %v1309_v28 = vmax.f32 %v1245_v16, 0.0  ;;  %v1249_v30 = vadd.f32 %v2089_v36, %v1178_v13 }
 0x14f   : > { %1368 = vst.msk [vmem:[%s2423_s3 + $0xf0] sm:$0xff] %vm1070_vm3, %v1304_v10  ;;  %1369 = vst.msk [vmem:[%s2423_s3 + $0xf8] sm:$0xff] %vm1070_vm3, %v1305_v14  ;;  %v1310_v29 = vmax.f32 %v1246_v17, 0.0  ;;  %v1184_v31 = vld [vmem:[#allocation2 + $0x168] sm:$0xff]  ;;  %v1185_v32 = vld [vmem:[#allocation2 + $0x170] sm:$0xff]  ;;  %v1311_v33 = vmax.f32 %v1247_v22, 0.0  ;;  %v1250_v35 = vadd.f32 %v2089_v36, %v1179_v18  ;;  %v1251_v37 = vadd.f32 %v2089_v36, %v1180_v19 }
 0x150   : > { %1370 = vst.msk [vmem:[%s2423_s3 + $0x100] sm:$0xff] %vm1070_vm3, %v1306_v20  ;;  %1371 = vst.msk [vmem:[%s2423_s3 + $0x108] sm:$0xff] %vm1070_vm3, %v1307_v21  ;;  %v1312_v34 = vmax.f32 %v1248_v23, 0.0  ;;  %v1186_v38 = vld [vmem:[#allocation2 + $0x178] sm:$0xff]  ;;  %v1313_v39 = vmax.f32 %v1249_v30, 0.0  ;;  %v1252_v40 = vadd.f32 %v2089_v36, %v1181_v24  ;;  %v1253_v41 = vadd.f32 %v2089_v36, %v1182_v25  ;;  %v1187_v43 = vld [vmem:[#allocation2 + $0x180] sm:$0xff] }
 0x151   : > { %1372 = vst.msk [vmem:[%s2423_s3 + $0x110] sm:$0xff] %vm1070_vm3, %v1308_v27  ;;  %1373 = vst.msk [vmem:[%s2423_s3 + $0x118] sm:$0xff] %vm1070_vm3, %v1309_v28  ;;  %v1254_v42 = vadd.f32 %v2089_v36, %v1183_v26  ;;  %v1188_v44 = vld [vmem:[#allocation2 + $0x188] sm:$0xff]  ;;  %v1314_v45 = vmax.f32 %v1250_v35, 0.0  ;;  %v1315_v46 = vmax.f32 %v1251_v37, 0.0  ;;  %v1255_v47 = vadd.f32 %v2089_v36, %v1184_v31  ;;  %v1189_v49 = vld [vmem:[#allocation2 + $0x190] sm:$0xff] }
 0x152   : > { %1374 = vst.msk [vmem:[%s2423_s3 + $0x120] sm:$0xff] %vm1070_vm3, %v1310_v29  ;;  %1375 = vst.msk [vmem:[%s2423_s3 + $0x128] sm:$0xff] %vm1070_vm3, %v1311_v33  ;;  %v1256_v48 = vadd.f32 %v2089_v36, %v1185_v32  ;;  %v1190_v50 = vld [vmem:[#allocation2 + $0x198] sm:$0xff]  ;;  %v1191_v51 = vld [vmem:[#allocation2 + $0x1a0] sm:$0xff]  ;;  %v1316_v52 = vmax.f32 %v1252_v40, 0.0  ;;  %v1317_v53 = vmax.f32 %v1253_v41, 0.0  ;;  %v1257_v55 = vadd.f32 %v2089_v36, %v1186_v38 }
 0x153   : > { %1376 = vst.msk [vmem:[%s2423_s3 + $0x130] sm:$0xff] %vm1070_vm3, %v1312_v34  ;;  %1377 = vst.msk [vmem:[%s2423_s3 + $0x138] sm:$0xff] %vm1070_vm3, %v1313_v39  ;;  %v1318_v54 = vmax.f32 %v1254_v42, 0.0  ;;  %v1192_v56 = vld [vmem:[#allocation2 + $0x1a8] sm:$0xff]  ;;  %v1193_v57 = vld [vmem:[#allocation2 + $0x1b0] sm:$0xff]  ;;  %v1319_v58 = vmax.f32 %v1255_v47, 0.0  ;;  %v1258_v60 = vadd.f32 %v2089_v36, %v1187_v43  ;;  %v1259_v61 = vadd.f32 %v2089_v36, %v1188_v44 }
 0x154   : > { %1378 = vst.msk [vmem:[%s2423_s3 + $0x140] sm:$0xff] %vm1070_vm3, %v1314_v45  ;;  %1379 = vst.msk [vmem:[%s2423_s3 + $0x148] sm:$0xff] %vm1070_vm3, %v1315_v46  ;;  %v1320_v59 = vmax.f32 %v1256_v48, 0.0  ;;  %v1194_v62 = vld [vmem:[#allocation2 + $0x1b8] sm:$0xff]  ;;  %v1321_v63 = vmax.f32 %v1257_v55, 0.0  ;;  %v1260_v0 = vadd.f32 %v2089_v36, %v1189_v49  ;;  %v1261_v1 = vadd.f32 %v2089_v36, %v1190_v50  ;;  %v1195_v3 = vld [vmem:[#allocation2 + $0x1c0] sm:$0xff] }
 0x155   : > { %1380 = vst.msk [vmem:[%s2423_s3 + $0x150] sm:$0xff] %vm1070_vm3, %v1316_v52  ;;  %1381 = vst.msk [vmem:[%s2423_s3 + $0x158] sm:$0xff] %vm1070_vm3, %v1317_v53  ;;  %v1262_v2 = vadd.f32 %v2089_v36, %v1191_v51  ;;  %v1196_v4 = vld [vmem:[#allocation2 + $0x1c8] sm:$0xff]  ;;  %v1322_v5 = vmax.f32 %v1258_v60, 0.0  ;;  %v1323_v6 = vmax.f32 %v1259_v61, 0.0  ;;  %v1263_v7 = vadd.f32 %v2089_v36, %v1192_v56  ;;  %v1197_v9 = vld [vmem:[#allocation2 + $0x1d0] sm:$0xff] }
 0x156   : > { %1382 = vst.msk [vmem:[%s2423_s3 + $0x160] sm:$0xff] %vm1070_vm3, %v1318_v54  ;;  %1383 = vst.msk [vmem:[%s2423_s3 + $0x168] sm:$0xff] %vm1070_vm3, %v1319_v58  ;;  %v1264_v8 = vadd.f32 %v2089_v36, %v1193_v57  ;;  %v1198_v10 = vld [vmem:[#allocation2 + $0x1d8] sm:$0xff]  ;;  %v1199_v11 = vld [vmem:[#allocation2 + $0x1e0] sm:$0xff]  ;;  %v1324_v12 = vmax.f32 %v1260_v0, 0.0  ;;  %v1325_v13 = vmax.f32 %v1261_v1, 0.0  ;;  %v1265_v15 = vadd.f32 %v2089_v36, %v1194_v62 }
 0x157   : > { %1384 = vst.msk [vmem:[%s2423_s3 + $0x170] sm:$0xff] %vm1070_vm3, %v1320_v59  ;;  %1385 = vst.msk [vmem:[%s2423_s3 + $0x178] sm:$0xff] %vm1070_vm3, %v1321_v63  ;;  %v1326_v14 = vmax.f32 %v1262_v2, 0.0  ;;  %v1200_v16 = vld [vmem:[#allocation2 + $0x1e8] sm:$0xff]  ;;  %v1201_v17 = vld [vmem:[#allocation2 + $0x1f0] sm:$0xff]  ;;  %v1327_v18 = vmax.f32 %v1263_v7, 0.0  ;;  %v1266_v20 = vadd.f32 %v2089_v36, %v1195_v3  ;;  %v1267_v21 = vadd.f32 %v2089_v36, %v1196_v4 }
 0x158   : > { %1386 = vst.msk [vmem:[%s2423_s3 + $0x180] sm:$0xff] %vm1070_vm3, %v1322_v5  ;;  %1387 = vst.msk [vmem:[%s2423_s3 + $0x188] sm:$0xff] %vm1070_vm3, %v1323_v6  ;;  %v1328_v19 = vmax.f32 %v1264_v8, 0.0  ;;  %v1202_v22 = vld [vmem:[#allocation2 + $0x1f8] sm:$0xff]  ;;  %v1329_v23 = vmax.f32 %v1265_v15, 0.0  ;;  %v1268_v24 = vadd.f32 %v2089_v36, %v1197_v9  ;;  %v1269_v25 = vadd.f32 %v2089_v36, %v1198_v10 }
 0x159   : > { %1388 = vst.msk [vmem:[%s2423_s3 + $0x190] sm:$0xff] %vm1070_vm3, %v1324_v12  ;;  %1389 = vst.msk [vmem:[%s2423_s3 + $0x198] sm:$0xff] %vm1070_vm3, %v1325_v13  ;;  %v1270_v26 = vadd.f32 %v2089_v36, %v1199_v11  ;;  %v1330_v27 = vmax.f32 %v1266_v20, 0.0  ;;  %v1331_v28 = vmax.f32 %v1267_v21, 0.0  ;;  %v1271_v29 = vadd.f32 %v2089_v36, %v1200_v16 }
 0x15a   : > { %1390 = vst.msk [vmem:[%s2423_s3 + $0x1a0] sm:$0xff] %vm1070_vm3, %v1326_v14  ;;  %1391 = vst.msk [vmem:[%s2423_s3 + $0x1a8] sm:$0xff] %vm1070_vm3, %v1327_v18  ;;  %v1272_v30 = vadd.f32 %v2089_v36, %v1201_v17  ;;  %v1332_v31 = vmax.f32 %v1268_v24, 0.0  ;;  %v1333_v32 = vmax.f32 %v1269_v25, 0.0  ;;  %v1273_v34 = vadd.f32 %v2089_v36, %v1202_v22 }
 0x15b   : > { %1392 = vst.msk [vmem:[%s2423_s3 + $0x1b0] sm:$0xff] %vm1070_vm3, %v1328_v19  ;;  %1393 = vst.msk [vmem:[%s2423_s3 + $0x1b8] sm:$0xff] %vm1070_vm3, %v1329_v23  ;;  %v1334_v33 = vmax.f32 %v1270_v26, 0.0  ;;  %v1335_v35 = vmax.f32 %v1271_v29, 0.0 }
 0x15c   : > { %1394 = vst.msk [vmem:[%s2423_s3 + $0x1c0] sm:$0xff] %vm1070_vm3, %v1330_v27  ;;  %1395 = vst.msk [vmem:[%s2423_s3 + $0x1c8] sm:$0xff] %vm1070_vm3, %v1331_v28  ;;  %v1336_v37 = vmax.f32 %v1272_v30, 0.0  ;;  %v1337_v36 = vmax.f32 %v1273_v34, 0.0 }
 0x15d   : > { %1396 = vst.msk [vmem:[%s2423_s3 + $0x1d0] sm:$0xff] %vm1070_vm3, %v1332_v31  ;;  %1397 = vst.msk [vmem:[%s2423_s3 + $0x1d8] sm:$0xff] %vm1070_vm3, %v1333_v32 }
 0x15e   : > { %1398 = vst.msk [vmem:[%s2423_s3 + $0x1e0] sm:$0xff] %vm1070_vm3, %v1334_v33  ;;  %1399 = vst.msk [vmem:[%s2423_s3 + $0x1e8] sm:$0xff] %vm1070_vm3, %v1335_v35 }
 0x15f   : > { %1400 = vst.msk [vmem:[%s2423_s3 + $0x1f0] sm:$0xff] %vm1070_vm3, %v1336_v37  ;;  %1401 = vst.msk [vmem:[%s2423_s3 + $0x1f8] sm:$0xff] %vm1070_vm3, %v1337_v36 }
 0x160 PF: > { %s13_s14 = sadd.s32 1, %s1772_s14   ;;  %s2424_s12 = smov %s1768_s13 }
 0x161   : > { %p10_p7 = scmp.ge.s32.totalorder %s13_s14, 11   ;;  %s2425_s13 = smov %s2427_s15 }
 0x163   :  { %12 = sbr.rel (!%p10_p7) target bundleno = 2 (0x2), region = 76 }

</bundles_post_ra>
